<compile_context>
chip_gen: v7x
topology: tpu7x:2x2x1
jax: 0.10.0
libtpu: 0.0.40
codegen_flags: <defaults>
</compile_context>

<pallas_src>
import math

import jax
import jax.numpy as jnp
from jax.experimental import pallas as pl
from jax.experimental.pallas import tpu as pltpu


def _vmem_limit_bytes():
    """Generation-dependent scoped-VMEM ceiling (v7x has half the VMEM)."""
    try:
        kind = jax.devices()[0].device_kind.lower()
    except Exception:
        kind = ""
    if "v7" in kind:
        return 48 * 1024 * 1024
    return 100 * 1024 * 1024


# ---------------------------------------------------------------------------
# Kernel A: layer 1, tiled over (dst-row blocks, src/K blocks)
#   acc[tm,H] += adjD_block(bf16) @ xw1_block(bf16)          (f32 accumulate)
#   at last K step: h_block = sigmoid(acc + b1)  -> bf16
# (adjD already has the 1/n row scaling folded in.)
# ---------------------------------------------------------------------------
def layer1_kernel(adj_ref, xw1_ref, b1_ref, h_ref, acc_ref):
    k = pl.program_id(1)

    @pl.when(k == 0)
    def _():
        acc_ref[...] = jnp.zeros_like(acc_ref)

    acc_ref[...] += jnp.dot(adj_ref[...], xw1_ref[...],
                            preferred_element_type=jnp.float32)

    @pl.when(k == pl.num_programs(1) - 1)
    def _():
        h_ref[...] = jax.nn.sigmoid(acc_ref[...] + b1_ref[...]).astype(h_ref.dtype)


# ---------------------------------------------------------------------------
# Kernel B: layer 2 + global mean pool + final [H,1] projection
#   z_acc[tm,H]   += adjD_block(bf16) @ h_block(bf16)         (K accumulation)
#   at last K step: pool_acc[G,H] += pool_block[G,tm] @ z_acc (row accumulation)
#   at very last step: out = pool_acc @ W2 + b2
# ---------------------------------------------------------------------------
def layer2_pool_kernel(adj_ref, h_ref, pool_ref, w2_ref, b2_ref, out_ref,
                       z_acc, pool_acc):
    i = pl.program_id(0)
    k = pl.program_id(1)
    ni = pl.num_programs(0)
    nk = pl.num_programs(1)

    @pl.when((i == 0) & (k == 0))
    def _():
        pool_acc[...] = jnp.zeros_like(pool_acc)

    @pl.when(k == 0)
    def _():
        z_acc[...] = jnp.zeros_like(z_acc)

    z_acc[...] += jnp.dot(adj_ref[...], h_ref[...],
                          preferred_element_type=jnp.float32)

    @pl.when(k == nk - 1)
    def _():
        pool_acc[...] += jnp.dot(pool_ref[...], z_acc[...],
                                 preferred_element_type=jnp.float32)

    @pl.when((i == ni - 1) & (k == nk - 1))
    def _():
        out_ref[...] = (jnp.dot(pool_acc[...], w2_ref[...],
                                preferred_element_type=jnp.float32)
                        + b2_ref[...])


# ---------------------------------------------------------------------------
# Wrapper
# ---------------------------------------------------------------------------
def mpnn_forward(adj_bf16, x, pool, w1, b1, w2, b2, *, tm=256, tk=1024):
    n_pad = adj_bf16.shape[0]
    hidden = w1.shape[1]
    num_graphs = pool.shape[0]

    tm = min(tm, n_pad)
    tk = min(tk, n_pad)
    assert n_pad % tm == 0 and n_pad % tk == 0
    assert tm % 8 == 0
    assert tk % 128 == 0 or tk == n_pad          # adj lane dim
    assert tm % 128 == 0 or tm == n_pad          # pool is blocked (G, tm)

    grid = (n_pad // tm, n_pad // tk)
    vmem_limit = _vmem_limit_bytes()

    # Trivial [N, C_in] @ [C_in, H] left to XLA; result streamed as bf16.
    xw1 = jnp.dot(x, w1, preferred_element_type=jnp.float32).astype(jnp.bfloat16)

    # ---- layer 1: h = sigmoid((D A) @ (x W1) + b1) ----
    h = pl.pallas_call(
        layer1_kernel,
        out_shape=jax.ShapeDtypeStruct((n_pad, hidden), jnp.bfloat16),
        grid=grid,
        in_specs=[
            pl.BlockSpec((tm, tk), lambda i, k: (i, k)),       # adjD (bf16, streamed)
            pl.BlockSpec((tk, hidden), lambda i, k: (k, 0)),   # x @ W1 (bf16)
            pl.BlockSpec((1, hidden), lambda i, k: (0, 0)),    # b1 (resident)
        ],
        out_specs=pl.BlockSpec((tm, hidden), lambda i, k: (i, 0)),
        scratch_shapes=[pltpu.VMEM((tm, hidden), jnp.float32)],
        compiler_params=pltpu.CompilerParams(
            dimension_semantics=("parallel", "arbitrary"),
            vmem_limit_bytes=vmem_limit),
    )(adj_bf16, xw1, b1)

    # ---- layer 2 + mean pool + projection ----
    out = pl.pallas_call(
        layer2_pool_kernel,
        out_shape=jax.ShapeDtypeStruct((num_graphs, 1), jnp.float32),
        grid=grid,
        in_specs=[
            pl.BlockSpec((tm, tk), lambda i, k: (i, k)),        # adjD (bf16, streamed)
            pl.BlockSpec((tk, hidden), lambda i, k: (k, 0)),    # h (bf16)
            pl.BlockSpec((num_graphs, tm), lambda i, k: (0, i)),# mean-pool rows
            pl.BlockSpec((hidden, 1), lambda i, k: (0, 0)),     # W2 (resident)
            pl.BlockSpec((1, 1), lambda i, k: (0, 0)),          # b2 (resident)
        ],
        out_specs=pl.BlockSpec((num_graphs, 1), lambda i, k: (0, 0)),
        scratch_shapes=[pltpu.VMEM((tm, hidden), jnp.float32),
                        pltpu.VMEM((num_graphs, hidden), jnp.float32)],
        compiler_params=pltpu.CompilerParams(
            dimension_semantics=("arbitrary", "arbitrary"),
            vmem_limit_bytes=vmem_limit),
    )(adj_bf16, h, pool, w2, b2)
    return out


# ---------------------------------------------------------------------------
# Glue: graph preprocessing (padded, inv_n folded into adjacency) + param init
# ---------------------------------------------------------------------------
def build_graph_tensors(edge_index, edge_weight, batch, num_nodes, num_graphs,
                        n_pad):
    src, dst = edge_index[0], edge_index[1]
    # adj[dst, src] += edge_weight   (PyG flow source_to_target, aggr='add')
    adj = jnp.zeros((n_pad, n_pad), jnp.float32).at[dst, src].add(edge_weight)

    counts = jnp.zeros((num_graphs,), jnp.float32).at[batch].add(1.0)  # bincount
    inv_n = jnp.zeros((n_pad,), jnp.float32)
    inv_n = inv_n.at[:num_nodes].set((1.0 / counts)[batch])

    # Fold D = diag(1/n) into the adjacency, then round once to bf16.
    adj_scaled_f32 = adj * inv_n[:, None]
    adj_bf16 = adj_scaled_f32.astype(jnp.bfloat16)

    # Mean-pool matrix, stored [G, n_pad] (lane-dense for the (G, tm) blocks).
    one_hot = (batch[:, None] == jnp.arange(num_graphs)[None, :]).astype(jnp.float32)
    pool = jnp.zeros((num_graphs, n_pad), jnp.float32)
    pool = pool.at[:, :num_nodes].set((one_hot / counts[None, :]).T)
    return adj_scaled_f32, adj_bf16, pool


def xavier_uniform(key, fan_in, fan_out):
    bound = math.sqrt(6.0 / (fan_in + fan_out))
    # PyTorch weight is [out, in]; we store its transpose [in, out].
    return jax.random.uniform(key, (fan_in, fan_out), jnp.float32, -bound, bound)


# ---------------------------------------------------------------------------
# Pure-JAX references
# ---------------------------------------------------------------------------
def mpnn_reference_bf16(adj_bf16, x, pool, w1, b1, w2, b2):
    """Same dtype policy as the kernels (bf16 adj / xw1 / h, f32 accumulation)."""
    xw1 = jnp.dot(x, w1, preferred_element_type=jnp.float32).astype(jnp.bfloat16)
    h = jax.nn.sigmoid(jnp.dot(adj_bf16, xw1, preferred_element_type=jnp.float32) + b1)
    h = h.astype(jnp.bfloat16)
    z = jnp.dot(adj_bf16, h, preferred_element_type=jnp.float32)
    return jnp.dot(pool, z) @ w2 + b2


def mpnn_reference_f32(adj_scaled_f32, x, pool, w1, b1, w2, b2):
    """Full-precision reference (semantic parity with the PyTorch module)."""
    h = jax.nn.sigmoid(adj_scaled_f32 @ (x @ w1) + b1)
    z = adj_scaled_f32 @ h
    return pool @ z @ w2 + b2


if __name__ == "__main__":
    key = jax.random.PRNGKey(0)
    k_x, k_ew, k_src, k_dst, k_w1, k_w2 = jax.random.split(key, 6)

    # Small deterministic batch: 2 graphs x 8 nodes, 4 input features, hidden=32.
    num_graphs = 2
    nodes_per_graph = 8
    num_nodes = num_graphs * nodes_per_graph
    in_channels = 4
    hidden_channels = 32
    num_edges_per_graph = 20
    tm, tk = 128, 128
    n_pad = 256                     # pad so the test exercises a 2x2 grid

    x = jax.random.normal(k_x, (num_nodes, in_channels), jnp.float32)
    x_pad = jnp.zeros((n_pad, in_channels), jnp.float32).at[:num_nodes].set(x)
    batch = jnp.repeat(jnp.arange(num_graphs, dtype=jnp.int32), nodes_per_graph)

    # Random intra-graph edges (deterministic).
    src_local = jax.random.randint(k_src, (num_graphs, num_edges_per_graph),
                                   0, nodes_per_graph)
    dst_local = jax.random.randint(k_dst, (num_graphs, num_edges_per_graph),
                                   0, nodes_per_graph)
    offsets = (jnp.arange(num_graphs, dtype=jnp.int32) * nodes_per_graph)[:, None]
    edge_index = jnp.stack([(src_local + offsets).reshape(-1),
                            (dst_local + offsets).reshape(-1)], axis=0)
    edge_weight = jax.random.uniform(k_ew, (edge_index.shape[1],), jnp.float32)

    # Parameters (Xavier-uniform weights, zero biases), matching MPNNLayer.__init__.
    w1 = xavier_uniform(k_w1, in_channels, hidden_channels)
    b1 = jnp.zeros((1, hidden_channels), jnp.float32)
    w2 = xavier_uniform(k_w2, hidden_channels, 1)
    b2 = jnp.zeros((1, 1), jnp.float32)

    adj_scaled_f32, adj_bf16, pool = build_graph_tensors(
        edge_index, edge_weight, batch, num_nodes, num_graphs, n_pad)

    out = mpnn_forward(adj_bf16, x_pad, pool, w1, b1, w2, b2, tm=tm, tk=tk)
    out = jax.block_until_ready(out)

    ref_bf16 = mpnn_reference_bf16(adj_bf16, x_pad, pool, w1, b1, w2, b2)
    ref_f32 = mpnn_reference_f32(adj_scaled_f32, x_pad, pool, w1, b1, w2, b2)
    assert out.shape == (num_graphs, 1)
    # Exactness vs. the same-dtype-policy reference.
    assert jnp.allclose(out, ref_bf16, atol=1e-3, rtol=1e-3), (out, ref_bf16)
    # Semantic parity with the f32 module (bf16 adjacency/activation rounding only).
    assert jnp.allclose(out, ref_f32, atol=1e-2, rtol=1e-2), (out, ref_f32)

    print("KERNEL_OK")
</pallas_src>

<mosaic_0001>
module attributes {stable_mosaic.version = 11 : i64} {
  func.func @layer1_kernel(%arg0: i32, %arg1: i32, %arg2: memref<128x128xbf16, #tpu.memory_space<vmem>>, %arg3: memref<128x32xbf16, #tpu.memory_space<vmem>>, %arg4: memref<1x32xf32, #tpu.memory_space<vmem>>, %arg5: memref<128x32xbf16, #tpu.memory_space<vmem>>, %arg6: memref<128x32xf32, #tpu.memory_space<vmem>>) attributes {dimension_semantics = [#tpu.dimension_semantics<parallel>, #tpu.dimension_semantics<arbitrary>], iteration_bounds = array<i64: 2, 2>, scalar_prefetch = 0 : i64, scratch_operands = 1 : i64, tpu.core_type = #tpu.core_type<tc>, window_params = [{transform_indices = @transform_0, window_bounds = array<i64: 128, 128>}, {transform_indices = @transform_1, window_bounds = array<i64: 128, 32>}, {pipeline_mode = #tpu.pipeline_mode<synchronous>, transform_indices = @transform_2, window_bounds = array<i64: 1, 32>}, {transform_indices = @transform_3, window_bounds = array<i64: 128, 32>}]} {
    %c0_i32 = arith.constant 0 : i32
    %0 = arith.cmpi eq, %arg1, %c0_i32 : i32
    %1 = arith.extui %0 : i1 to i32
    %c0_i32_0 = arith.constant 0 : i32
    %2 = arith.cmpi ne, %1, %c0_i32_0 : i32
    scf.if %2 {
      %cst_9 = arith.constant 0.000000e+00 : f32
      %12 = vector.broadcast %cst_9 : f32 to vector<128x32xf32>
      %c0_10 = arith.constant 0 : index
      %c0_11 = arith.constant 0 : index
      %13 = vector.load %arg6[%c0_10, %c0_11] : memref<128x32xf32, #tpu.memory_space<vmem>>, vector<128x32xf32>
      tpu.vector_store %arg6[%c0_10, %c0_11], %12 {strides = array<i32>} : memref<128x32xf32, #tpu.memory_space<vmem>>, vector<128x32xf32>,
    } else {
    }
    %c0 = arith.constant 0 : index
    %c0_1 = arith.constant 0 : index
    %3 = vector.load %arg6[%c0, %c0_1] : memref<128x32xf32, #tpu.memory_space<vmem>>, vector<128x32xf32>
    %c0_2 = arith.constant 0 : index
    %c0_3 = arith.constant 0 : index
    %4 = vector.load %arg2[%c0_2, %c0_3] : memref<128x128xbf16, #tpu.memory_space<vmem>>, vector<128x128xbf16>
    %c0_4 = arith.constant 0 : index
    %c0_5 = arith.constant 0 : index
    %5 = vector.load %arg3[%c0_4, %c0_5] : memref<128x32xbf16, #tpu.memory_space<vmem>>, vector<128x32xbf16>
    %cst = arith.constant dense<0.000000e+00> : vector<128x32xf32>
    %6 = tpu.matmul %4, %5, %cst {dimension_numbers = #tpu.dot_dimension_numbers<[1], [0], [0], [1], [0, 0, 1, 1], [], []>} : vector<128x128xbf16>, vector<128x32xbf16>, vector<128x32xf32> -> vector<128x32xf32>
    %7 = arith.addf %3, %6 : vector<128x32xf32>
    %c0_6 = arith.constant 0 : index
    %c0_7 = arith.constant 0 : index
    %8 = vector.load %arg6[%c0_6, %c0_7] : memref<128x32xf32, #tpu.memory_space<vmem>>, vector<128x32xf32>
    tpu.vector_store %arg6[%c0_6, %c0_7], %7 {strides = array<i32>} : memref<128x32xf32, #tpu.memory_space<vmem>>, vector<128x32xf32>,
    %c1_i32 = arith.constant 1 : i32
    %9 = arith.cmpi eq, %arg1, %c1_i32 : i32
    %10 = arith.extui %9 : i1 to i32
    %c0_i32_8 = arith.constant 0 : i32
    %11 = arith.cmpi ne, %10, %c0_i32_8 : i32
    scf.if %11 {
      %c0_9 = arith.constant 0 : index
      %c0_10 = arith.constant 0 : index
      %12 = vector.load %arg6[%c0_9, %c0_10] : memref<128x32xf32, #tpu.memory_space<vmem>>, vector<128x32xf32>
      %c0_11 = arith.constant 0 : index
      %c0_12 = arith.constant 0 : index
      %13 = vector.load %arg4[%c0_11, %c0_12] : memref<1x32xf32, #tpu.memory_space<vmem>>, vector<1x32xf32>
      %14 = vector.broadcast %13 : vector<1x32xf32> to vector<128x32xf32>
      %15 = arith.addf %12, %14 : vector<128x32xf32>
      %16 = arith.negf %15 : vector<128x32xf32>
      %17 = math.exp %16 : vector<128x32xf32>
      %cst_13 = arith.constant 1.000000e+00 : f32
      %18 = vector.broadcast %cst_13 : f32 to vector<128x32xf32>
      %19 = arith.addf %18, %17 : vector<128x32xf32>
      %20 = arith.divf %18, %19 : vector<128x32xf32>
      %21 = arith.truncf %20 : vector<128x32xf32> to vector<128x32xbf16>
      %c0_14 = arith.constant 0 : index
      %c0_15 = arith.constant 0 : index
      %22 = vector.load %arg5[%c0_14, %c0_15] : memref<128x32xbf16, #tpu.memory_space<vmem>>, vector<128x32xbf16>
      tpu.vector_store %arg5[%c0_14, %c0_15], %21 {strides = array<i32>} : memref<128x32xbf16, #tpu.memory_space<vmem>>, vector<128x32xbf16>,
    } else {
    }
    return
  }
  func.func @transform_0(%arg0: i32, %arg1: i32) -> (i32, i32) {
    %c0_i32 = arith.constant 0 : i32
    return %arg0, %arg1 : i32, i32
  }
  func.func @transform_1(%arg0: i32, %arg1: i32) -> (i32, i32) {
    %c0_i32 = arith.constant 0 : i32
    %c0_i32_0 = arith.constant 0 : i32
    return %arg1, %c0_i32 : i32, i32
  }
  func.func @transform_2(%arg0: i32, %arg1: i32) -> (i32, i32) {
    %c0_i32 = arith.constant 0 : i32
    %c0_i32_0 = arith.constant 0 : i32
    %c0_i32_1 = arith.constant 0 : i32
    return %c0_i32, %c0_i32_0 : i32, i32
  }
  func.func @transform_3(%arg0: i32, %arg1: i32) -> (i32, i32) {
    %c0_i32 = arith.constant 0 : i32
    %c0_i32_0 = arith.constant 0 : i32
    return %arg0, %c0_i32 : i32, i32
  }
}

</mosaic_0001>

<bundles_post_ra>
// kernel: tpu_custom_call.1
= control target key start
LH: loop header
LB: loop body
LE: loop exit
PB: predicated region body
PF: predicated region fallthrough
CT: control target
= control target key end

     0   :  { %s2043_s0 = inlined_call_operand.hbm [shape: bf16[256,256], index: 0, kind: input, shape index: {}]   ;;  %s2044_s1 = inlined_call_operand.hbm [shape: bf16[256,32], index: 1, kind: input, shape index: {}]   ;;  %s2045_s2 = inlined_call_operand.hbm [shape: f32[1,32], index: 2, kind: input, shape index: {}]   ;;  %s2046_s3 = inlined_call_operand.hbm [shape: bf16[256,32], index: 3, kind: output, shape index: {}]  }
   0x1   :  { %2066 = sst [smem:[#allocation24_spill]] %s2043_s0 }
   0x2   :  { %2067 = sst [smem:[#allocation25_spill]] %s2045_s2 }
   0x3   :  { %2068 = sst [smem:[#allocation26_spill]] %s2046_s3 }
   0x4   :  { %8 = vsyncpa [#allocation4], 0 }
   0x5   :  { %10 = vsyncpa [#allocation4 + $0x1], 0 }
   0x6   :  { %11 = vsyncpa [#allocation7], 0 }
   0x7   :  { %13 = vsyncpa [#allocation7 + $0x1], 0 }
   0x8   :  { %14 = vsyncpa [#allocation5], 0 }
   0x9   :  { %16 = vsyncpa [#allocation5 + $0x1], 0  ;;  %s1566_s12 = smov 0   ;;  %s1568_s13 = smov 0  }
   0xa   :  { %s1570_s14 = smov 0   ;;  %s1572_s15 = smov 0  }
   0xb   :  { %s1574_s16 = smov 0   ;;  %s1576_s17 = smov 0  }
   0xc   :  { %s1578_s18 = smov 0   ;;  %s1580_s19 = smov 0  }
   0xd   :  { %s1582_s20 = smov 0   ;;  %s1584_s21 = smov 0  }
   0xe   :  { %s1586_s22 = smov 0   ;;  %s1588_s23 = smov 0  }
   0xf   :  { %s1590_s24 = smov 0   ;;  %s1592_s25 = smov 0  }
  0x10 LB: > { %2069 = sst [smem:[#allocation14_spill]] %s1482_s12  ;;  %s1633_s26 = sadd.s32 4294967295, %s1534_s25   ;;  %s1534_s25 = sphi %s1592_s25, %s22_s25   ;;  %s1530_s24 = sphi %s1590_s24, %s2119_s24   ;;  %s1526_s23 = sphi %s1588_s23, %s2129_s23   ;;  %s1522_s22 = sphi %s1586_s22, %s2117_s22   ;;  %s1518_s21 = sphi %s1584_s21, %s2128_s21   ;;  %s1514_s20 = sphi %s1582_s20, %s2127_s20   ;;  %s1510_s19 = sphi %s1580_s19, %s2126_s19   ;;  %s1506_s18 = sphi %s1578_s18, %s2125_s18   ;;  %s1502_s17 = sphi %s1576_s17, %s2124_s17   ;;  %s1498_s16 = sphi %s1574_s16, %s2123_s16   ;;  %s1494_s15 = sphi %s1572_s15, %s2122_s15   ;;  %s1490_s14 = sphi %s1570_s14, %s2121_s14   ;;  %s1486_s13 = sphi %s1568_s13, %s2120_s13   ;;  %s1482_s12 = sphi %s1566_s12, %s2116_s12  }
  0x11   : > { %2070 = sst [smem:[#allocation15_spill]] %s1486_s13  ;;  %s909_s27 = sadd.s32 4294967294, %s1534_s25  }
  0x12   : > { %2071 = sst [smem:[#allocation16_spill]] %s1518_s21  ;;  %p50_p0 = scmp.ne.s32.totalorder %s1514_s20, %s1510_s19 }
  0x13   : > { %2072 = sst [smem:[#allocation17_spill]] %s1522_s22  ;;  %p51_p1 = scmp.eq.s32.totalorder %s1534_s25, 0 }
  0x14   : > { %2073 = sst [smem:[#allocation18_spill]] %s1530_s24  ;;  %p56_p2 = scmp.ne.s32.totalorder %s1510_s19, %s1506_s18 }
  0x15   : > { %p2047_p3 = scmp.eq.s32.totalorder %s1633_s26, 0  ;;  %p1643_p4 = por %p51_p1, %p50_p0 }
  0x16   : > { %p76_p5 = scmp.ne.s32.totalorder %s1502_s17, %s1498_s16  ;;  %p82_p7 = scmp.ne.s32.totalorder %s1498_s16, %s1494_s15 }
  0x17   : > { %p1651_p6 = por %p2047_p3, %p56_p2  ;;  %p126_p10 = scmp.ne.s32.totalorder %s1490_s14, %s1486_s13 }
  0x18   : > { %p1656_p8 = por %p76_p5, %p51_p1  ;;  %p1663_p9 = por %p82_p7, %p2047_p3 }
  0x19   : > { %s2075_s4 = scalar_select %p1651_p6, 1, 0 }
  0x1a   : > { %s2077_s7 = scalar_select %p1663_p9, 1, 0 }
  0x1b   : > { %p127_p11 = scmp.eq.s32.totalorder %s1633_s26, 3  ;;  %p132_p12 = scmp.ne.s32.totalorder %s1486_s13, %s1482_s12 }
  0x1c   : > { %2078 = sst [smem:[#allocation19_spill]] %s2077_s7  ;;  %p133_p13 = scmp.eq.s32.totalorder %s909_s27, 3 }
  0x1d   : > { %p910_p0 = scmp.ge.s32.totalorder %s1534_s25, 1  ;;  %p1673_p2 = por %p127_p11, %p126_p10 }
  0x1e   : > { %p140_p1 = scmp.lt.s32.totalorder %s1534_s25, 5  ;;  %p1678_p5 = por %p133_p13, %p132_p12 }
  0x1f   : > { %s2079_s8 = scalar_select %p1673_p2, 1, 0 }
  0x20   : > { %s2081_s9 = scalar_select %p1678_p5, 1, 0 }
  0x21   : > { %2080 = sst [smem:[#allocation20_spill]] %s2079_s8  ;;  %p1682_p7 = pnand %p910_p0, %p140_p1 }
  0x22   : > { %2082 = sst [smem:[#allocation21_spill]] %s2081_s9  ;;  %s1536_s11 = smov [#allocation8]  }
  0x23   : > { %s2083_s10 = scalar_select %p1682_p7, 1, 0 }
  0x24   : > { %s153_s15 = sshll.u32 %s1536_s11, 4  ;;  %p1074_p3 = pneg %p1682_p7  ;;  %s154_s15 = int_to_ptr.vmem [resolvable:$true] %s153_s15 }
  0x25   : > { %p1090_p9 = scmp.lt.s32.totalorder %s1534_s25, 4  ;;  %p2084_p10 = scmp.eq.s32.totalorder %s1633_s26, 0 }
  0x26   : > { %s2088_s2 = sld [smem:[#allocation25_spill]] }
  0x27   : > { %p1691_p11 = pnand %p1074_p3, %p2084_p10  ;;  %p1697_p12 = pnand %p1090_p9, %p1643_p4 }
  0x28   : > { %p1703_p13 = pnand %p1090_p9, %p1656_p8 }
  0x29   : > { %s2086_s27 = scalar_select %p1697_p12, 1, 0 }
  0x2a   : > { %s2087_s28 = scalar_select %p1703_p13, 1, 0 }
  0x2b   : > { %p1294_p0 = pneg %p1691_p11 }
  0x2c   : > { %s1292_s29 = scalar_lea.hbm %s2088_s2, 16 }
  0x2d   : > { %p1293_p3 = scmp.ne.s32.totalorder %s2088_s2, %s1292_s29  ;;  %p1299_p10 = scmp.lt.u32.totalorder %s1292_s29, %s2088_s2 }
  0x2f   : > { %p1295_p1 = pnand %p1294_p0, %p1293_p3 }
  0x31   : > { %p1296_p4 = pneg %p1295_p1 }
  0x33   : > { %p1301_p8 = pnand %p1299_p10, %p1296_p4 }
  0x35   : > { %1304 = shalt.err (!%p1301_p8)
}
  0x36   : > { %s1305_s5 = scalar_lea.vmem %s154_s15, 16  ;;  %s1312_s6 = scalar_lea.vmem %s154_s15, 32 }
  0x37   : > { %p1306_p9 = scmp.ne.s32.totalorder %s154_s15, %s1305_s5  ;;  %p1313_p6 = scmp.lt.s32.totalorder %s154_s15, %s154_s15 }
  0x38   : > { %p1314_p7 = scmp.lt.s32.totalorder %s1312_s6, %s1305_s5 }
  0x39   : > { %p1308_p5 = pnand %p1306_p9, %p1294_p0 }
  0x3a   : > { %p1315_p13 = por %p1314_p7, %p1313_p6 }
  0x3b   : > { %p1309_p2 = pneg %p1308_p5 }
  0x3d   : > { %p1316_p12 = pnand %p1315_p13, %p1309_p2 }
  0x3f   : > { %1319 = shalt.err (!%p1316_p12)
}
  0x40   : > { %1077 = dma.hbm_to_vmem [thread:$0]  (!%p1691_p11), %s2088_s2, 16, %s154_s15, [#allocation7]  }
  0x41   : > { %s34_s3 = sadd.s32 1, %s1530_s24  ;;  %s31_s29 = sadd.s32 1, %s1526_s23 }
  0x42   : > { %s164_s11 = sand.u32 1, %s1514_s20   ;;  %p32_p6 = scmp.ge.s32.totalorder %s31_s29, 2 }
  0x43   : > { %s913_s30 = sshll.u32 %s164_s11, 6  ;;  %s981_s18 = sshll.u32 %s1530_s24, 5 }
  0x44   : > { %s2131_s29 = smov (%p32_p6, %s31_s29), 0  ;;  %s2133_s3 = smov (!%p32_p6, %s34_s3), %s1530_s24 }
  0x45   : > { %2089 = sst [smem:[#allocation22_spill]] %s2131_s29  ;;  %s39_s5 = ssub.s32 %s1526_s23, %s2131_s29 }
  0x46   : > { %p36_p2 = scmp.ge.s32.totalorder %s2133_s3, 2  ;;  %p67_p5 = scmp.eq.s32.totalorder %s39_s5, 0 }
  0x47   : > { %s174_s15 = sadd.s32 %s1526_s23, %s981_s18  ;;  %s168_s6 = scalar_lea.vmem [#allocation3], %s913_s30 }
  0x48   : > { %s177_s12 = sshll.u32 %s168_s6, 4  ;;  %s2135_s3 = smov (%p36_p2, %s2133_s3), 0  ;;  %s1757_s12 = int_to_ptr.vmem [resolvable:$true] %s177_s12 }
  0x49   : > { %2090 = sst [smem:[#allocation23_spill]] %s2135_s3  ;;  %s2091_s9 = sadd.s32 1, %s1502_s17 }
  0x4a   : > { %s1738_s2 = scalar_select %p67_p5, %s1502_s17, %s2091_s9  }
  0x4b   : > { %s38_s8 = ssub.s32 %s1530_s24, %s2135_s3  ;;  %s916_s22 = sshll.u32 %s174_s15, 6 }
  0x4c   : > { %s40_s21 = sor.u32 %s39_s5, %s38_s8  ;;  %p114_p7 = scmp.eq.s32.totalorder %s38_s8, 0 }
  0x4d   : > { %p41_p11 = scmp.eq.s32.totalorder %s40_s21, 0  ;;  %s2092_s0 = sld [smem:[#allocation24_spill]] }
  0x4e   : > { %s2093_s30 = sadd.s32 1, %s1490_s14  ;;  %s2094_s6 = sadd.s32 1, %s1514_s20 }
  0x4f   : > { %s1750_s18 = scalar_select %p114_p7, %s1490_s14, %s2093_s30  }
  0x50   : > { %s1755_s9 = scalar_select %p41_p11, %s1514_s20, %s2094_s6  }
  0x51   : > { %s1759_s5 = scalar_lea.sflag [#allocation4], %s164_s11  ;;  %p2095_p13 = scmp.ne.s32.totalorder %s2086_s27, 0 }
  0x53   : > { %s1745_s7 = scalar_lea.hbm %s2092_s0, %s916_s22  ;;  %p1322_p3 = pneg %p2095_p13 }
  0x54   : > { %s1320_s21 = scalar_lea.hbm %s1745_s7, 1024  ;;  %s1325_s8 = scalar_lea.hbm %s2092_s0, 4096 }
  0x55   : > { %p1321_p12 = scmp.ne.s32.totalorder %s1745_s7, %s1320_s21  ;;  %p1326_p4 = scmp.lt.u32.totalorder %s1745_s7, %s2092_s0 }
  0x56   : > { %p1327_p10 = scmp.lt.u32.totalorder %s1325_s8, %s1320_s21  ;;  %p1329_p9 = scmp.lt.u32.totalorder %s1320_s21, %s1745_s7 }
  0x57   : > { %p1323_p0 = pnand %p1322_p3, %p1321_p12 }
  0x58   : > { %p1328_p8 = por %p1327_p10, %p1326_p4 }
  0x59   : > { %p1324_p1 = pneg %p1323_p0 }
  0x5a   : > { %p1330_p6 = por %p1329_p9, %p1328_p8 }
  0x5c   : > { %p1331_p2 = pnand %p1330_p6, %p1324_p1 }
  0x5e   : > { %1334 = shalt.err (!%p1331_p2)
}
  0x5f   : > { %s1335_s11 = scalar_lea.vmem %s1757_s12, 1024  ;;  %s1537_s30 = smov [#allocation3]  }
  0x60   : > { %p1336_p5 = scmp.ne.s32.totalorder %s1757_s12, %s1335_s11  ;;  %s1340_s6 = sshll.u32 %s1537_s30, 4  ;;  %s1341_s6 = int_to_ptr.vmem [resolvable:$false] %s1340_s6 }
  0x61   : > { %s1342_s13 = scalar_lea.vmem %s1341_s6, 2048  ;;  %p1343_p12 = scmp.lt.s32.totalorder %s1757_s12, %s1341_s6 }
  0x62   : > { %p1338_p7 = pnand %p1336_p5, %p1322_p3  ;;  %p1344_p0 = scmp.lt.s32.totalorder %s1342_s13, %s1335_s11 }
  0x64   : > { %p1339_p11 = pneg %p1338_p7  ;;  %p1345_p4 = por %p1344_p0, %p1343_p12 }
  0x66   : > { %p1346_p10 = pnand %p1345_p4, %p1339_p11 }
  0x68   : > { %1349 = shalt.err (!%p1346_p10)
}
  0x69   : > { %s1538_s21 = smov 128   ;;  %s1539_s22 = smov 64  }
  0x6a   : > { %s1540_s8 = smov 4   ;;  %s187_s29 = sand.u32 1, %s1534_s25  }
  0x6b   : > { %1081 = dma.hbm_to_vmem [thread:$0]  (!%p2095_p13), %s1745_s7, 1024, %s1757_s12, %s1759_s5, %s1538_s21, %s1539_s22, %s1540_s8  }
  0x6c   : > { %s189_s15 = sand.u32 1, %s1502_s17   ;;  %s982_s30 = sshll.u32 %s1526_s23, 10 }
  0x6d   : > { %s917_s11 = sshll.u32 %s189_s15, 6  ;;  %s1795_s0 = scalar_lea.hbm %s2044_s1, %s982_s30 }
  0x6e   : > { %s191_s3 = scalar_lea.vmem [#allocation6], %s917_s11  ;;  %s1799_s27 = scalar_lea.sflag [#allocation7], %s187_s29 }
  0x6f   : > { %s198_s24 = sshll.u32 %s191_s3, 4  ;;  %s1350_s7 = scalar_lea.hbm %s1795_s0, 1024  ;;  %s1797_s24 = int_to_ptr.vmem [resolvable:$true] %s198_s24 }
  0x70   : > { %p1351_p13 = scmp.ne.s32.totalorder %s1795_s0, %s1350_s7  ;;  %p2096_p3 = scmp.ne.s32.totalorder %s2087_s28, 0 }
  0x71   : > { %s1355_s21 = scalar_lea.hbm %s2044_s1, 2048  ;;  %p1356_p6 = scmp.lt.u32.totalorder %s1795_s0, %s2044_s1 }
  0x72   : > { %p1352_p1 = pneg %p2096_p3  ;;  %p1357_p2 = scmp.lt.u32.totalorder %s1355_s21, %s1350_s7 }
  0x73   : > { %p1359_p7 = scmp.lt.u32.totalorder %s1350_s7, %s1795_s0 }
  0x74   : > { %p1353_p8 = pnand %p1352_p1, %p1351_p13  ;;  %p1358_p5 = por %p1357_p2, %p1356_p6 }
  0x76   : > { %p1354_p9 = pneg %p1353_p8  ;;  %p1360_p11 = por %p1359_p7, %p1358_p5 }
  0x78   : > { %p1361_p12 = pnand %p1360_p11, %p1354_p9 }
  0x7a   : > { %1364 = shalt.err (!%p1361_p12)
}
  0x7b   : > { %s1365_s3 = scalar_lea.vmem %s1797_s24, 1024  ;;  %s1541_s29 = smov [#allocation6]  }
  0x7c   : > { %p1366_p0 = scmp.ne.s32.totalorder %s1797_s24, %s1365_s3  ;;  %s1370_s11 = sshll.u32 %s1541_s29, 4  ;;  %s1371_s11 = int_to_ptr.vmem [resolvable:$false] %s1370_s11 }
  0x7d   : > { %s1372_s6 = scalar_lea.vmem %s1371_s11, 2048  ;;  %p1373_p13 = scmp.lt.s32.totalorder %s1797_s24, %s1371_s11 }
  0x7e   : > { %p1368_p4 = pnand %p1366_p0, %p1352_p1  ;;  %p1374_p8 = scmp.lt.s32.totalorder %s1372_s6, %s1365_s3 }
  0x80   : > { %p1369_p10 = pneg %p1368_p4  ;;  %p1375_p6 = por %p1374_p8, %p1373_p13 }
  0x82   : > { %p1376_p2 = pnand %p1375_p6, %p1369_p10 }
  0x84   : > { %1379 = shalt.err (!%p1376_p2)
}
  0x85   : > { %1084 = dma.hbm_to_vmem [thread:$0]  (!%p2096_p3), %s1795_s0, 1024, %s1797_s24, %s1799_s27, %s1539_s22, %s1539_s22, %s1540_s8  }
  0x86   : > { %p2097_p1 = scmp.ne.s32.totalorder %s2083_s10, 0 }
  0x87   : > { %s212_s13 = sand.u32 (!%p2097_p1), 1, %s1510_s19   ;;  %p2098_p9 = scmp.ne.s32.totalorder (!%p2097_p1), %s2075_s4, 0 }
  0x88   : > { %210 = sbr.rel (%p2097_p1) target bundleno = 520 (0x208), region = 32  ;;  %s921_s7 = sshll.u32 (!%p2097_p1), %s212_s13, 6 }
  0x89   : > { %s213_s12 = scalar_lea.sflag (!%p2097_p1), [#allocation4], %s212_s13  ;;  %s1833_s5 = scalar_lea.vmem (!%p2097_p1), [#allocation3], %s921_s7 }
  0x8f   : > { %1465 = dma.done.wait (%p2098_p9), %s213_s12, 1024  }
  0x90   : > { %1467 = vsyncadd (%p2098_p9), %s213_s12, 4294966272  ;;  %s2099_s28 = sld [smem:[#allocation19_spill]]  ;;  %s221_s21 = sand.u32 1, %s1633_s26  }
  0x91   : > { %s223_s0 = sand.u32 1, %s1498_s16   ;;  %s222_s10 = scalar_lea.sflag [#allocation7], %s221_s21 }
  0x92   : > { %s922_s24 = sshll.u32 %s223_s0, 6 }
  0x93   : > { %s1841_s22 = scalar_lea.vmem [#allocation6], %s922_s24 }
  0x96   : > { %p2100_p3 = scmp.ne.s32.totalorder %s2099_s28, 0 }
  0x98   : > { %1469 = dma.done.wait (%p2100_p3), %s222_s10, 1024  }
  0x99   : > { %1471 = vsyncadd (%p2100_p3), %s222_s10, 4294966272  ;;  %p2101_p5 = scmp.eq.s32.totalorder %s1633_s26, 0 }
  0x9b   : > { %1473 = dma.done.wait (%p2101_p5), [#allocation7], 16   ;;  %p2102_p7 = pmov %p2101_p5 }
  0x9c   : > { %s2103_s4 = sld [smem:[#allocation15_spill]]  ;;  %s2104_s30 = sld [smem:[#allocation16_spill]] }
  0x9d   : > { %1475 = vsyncadd (%p2102_p7), [#allocation7], 4294967280 }
  0xa2   : > { %s254_s8 = sand.u32 1, %s2103_s4   ;;  %p925_p11 = scmp.ne.s32.totalorder %s2104_s30, 0 }
  0xa3   : > { %s924_s27 = sshll.u32 %s254_s8, 6  ;;  %vm265_vm0 = vcmask (!%p925_p11), 261120   ;;  %v1542_v0 = vmov (!%p925_p11), 0.0  }
  0xa4   : > { %s1854_s15 = scalar_lea.vmem [#allocation9], %s924_s27  ;;  %264 = sbr.rel (%p925_p11) target bundleno = 172 (0xac), region = 48  ;;  %266 = vst.msk [vmem:[#allocation2] sm:$0xff] (!%p925_p11), %vm265_vm0, %v1542_v0  ;;  %267 = vst.msk [vmem:[#allocation2 + $0x8] sm:$0xff] (!%p925_p11), %vm265_vm0, %v1542_v0 }
  0xa5   : > { %268 = vst.msk [vmem:[#allocation2 + $0x10] sm:$0xff] (!%p925_p11), %vm265_vm0, %v1542_v0  ;;  %269 = vst.msk [vmem:[#allocation2 + $0x18] sm:$0xff] (!%p925_p11), %vm265_vm0, %v1542_v0 }
  0xa6   : > { %270 = vst.msk [vmem:[#allocation2 + $0x20] sm:$0xff] (!%p925_p11), %vm265_vm0, %v1542_v0  ;;  %271 = vst.msk [vmem:[#allocation2 + $0x28] sm:$0xff] (!%p925_p11), %vm265_vm0, %v1542_v0 }
  0xa7   : > { %272 = vst.msk [vmem:[#allocation2 + $0x30] sm:$0xff] (!%p925_p11), %vm265_vm0, %v1542_v0  ;;  %273 = vst.msk [vmem:[#allocation2 + $0x38] sm:$0xff] (!%p925_p11), %vm265_vm0, %v1542_v0 }
  0xa8   : > { %274 = vst.msk [vmem:[#allocation2 + $0x40] sm:$0xff] (!%p925_p11), %vm265_vm0, %v1542_v0  ;;  %275 = vst.msk [vmem:[#allocation2 + $0x48] sm:$0xff] (!%p925_p11), %vm265_vm0, %v1542_v0 }
  0xa9   : > { %276 = vst.msk [vmem:[#allocation2 + $0x50] sm:$0xff] (!%p925_p11), %vm265_vm0, %v1542_v0  ;;  %277 = vst.msk [vmem:[#allocation2 + $0x58] sm:$0xff] (!%p925_p11), %vm265_vm0, %v1542_v0 }
  0xaa   : > { %278 = vst.msk [vmem:[#allocation2 + $0x60] sm:$0xff] (!%p925_p11), %vm265_vm0, %v1542_v0  ;;  %279 = vst.msk [vmem:[#allocation2 + $0x68] sm:$0xff] (!%p925_p11), %vm265_vm0, %v1542_v0 }
  0xab   : > { %280 = vst.msk [vmem:[#allocation2 + $0x70] sm:$0xff] %vm265_vm0, %v1542_v0  ;;  %281 = vst.msk [vmem:[#allocation2 + $0x78] sm:$0xff] %vm265_vm0, %v1542_v0 }
  0xac PF: > { %v1212_v1 = vld [vmem:[%s1841_s22] sm:$0xff]   ;;  %v1213_v2 = vld [vmem:[%s1841_s22 + $0x8] sm:$0xff]   ;;  %v1214_v3 = vld [vmem:[%s1841_s22 + $0x10] sm:$0xff]   ;;  %vm539_vm1 = vcmask 261120   ;;  %s2105_s26 = sld [smem:[#allocation16_spill]] }
  0xad   : > { %1016 = vmatprep.subr.bf16.mxu0 %v1212_v1  ;;  %1048 = vmatprep.subr.bf16.mxu1 %v1212_v1  ;;  %v1215_v4 = vld [vmem:[%s1841_s22 + $0x18] sm:$0xff]   ;;  %v1220_v5 = vld [vmem:[%s1833_s5] sm:$0xff]   ;;  %v1217_v8 = vld [vmem:[%s1841_s22 + $0x28] sm:$0xff]  }
  0xae   : > { %1017 = vmatpush3.bf16.msra.mxu0 %v1212_v1  ;;  %1056 = vmatpush3.bf16.msra.mxu1 %v1212_v1  ;;  %v1221_v6 = vld [vmem:[%s1833_s5 + $0x20] sm:$0xff]   ;;  %v1218_v9 = vld [vmem:[%s1841_s22 + $0x30] sm:$0xff]   ;;  %v1219_v10 = vld [vmem:[%s1841_s22 + $0x38] sm:$0xff]  }
  0xaf   : > { %1018 = vmatprep.subr.bf16.mxu0 %v1213_v2  ;;  %1049 = vmatprep.subr.bf16.mxu1 %v1213_v2  ;;  %v1216_v7 = vld [vmem:[%s1841_s22 + $0x20] sm:$0xff]   ;;  %v1222_v11 = vld [vmem:[%s1833_s5 + $0x8] sm:$0xff]   ;;  %v1224_v13 = vld [vmem:[%s1833_s5 + $0x10] sm:$0xff]  }
  0xb0   : > { %1032 = vmatprep.mubr.bf16.mxu0 %v1220_v5  ;;  %1040 = vmatprep.mubr.bf16.mxu1 %v1221_v6  ;;  %v1223_v12 = vld [vmem:[%s1833_s5 + $0x28] sm:$0xff]   ;;  %v1225_v14 = vld [vmem:[%s1833_s5 + $0x30] sm:$0xff]   ;;  %v1226_v15 = vld [vmem:[%s1833_s5 + $0x18] sm:$0xff]  }
  0xb1   : > { %v1227_v16 = vld [vmem:[%s1833_s5 + $0x38] sm:$0xff]   ;;  %v284_v17 = vld [vmem:[#allocation2 + $0x10] sm:$0xff]  ;;  %v282_v19 = vld [vmem:[#allocation2] sm:$0xff] }
  0xb2   : > { %1019 = vmatpush3.bf16.msra.mxu0 %v1213_v2  ;;  %1057 = vmatpush3.bf16.msra.mxu1 %v1213_v2  ;;  %v292_v18 = vld [vmem:[#allocation2 + $0x50] sm:$0xff]  ;;  %v290_v20 = vld [vmem:[#allocation2 + $0x40] sm:$0xff]  ;;  %v285_v23 = vld [vmem:[#allocation2 + $0x18] sm:$0xff]  ;;  %p942_p12 = scmp.ne.s32.totalorder %s2105_s26, 1 }
  0xb3   : > { %1020 = vmatprep.subr.bf16.mxu0 %v1214_v3  ;;  %1050 = vmatprep.subr.bf16.mxu1 %v1214_v3  ;;  %v293_v24 = vld [vmem:[#allocation2 + $0x58] sm:$0xff]  ;;  %v283_v29 = vld [vmem:[#allocation2 + $0x8] sm:$0xff]  ;;  %v288_v41 = vld [vmem:[#allocation2 + $0x30] sm:$0xff]  ;;  %vm759_vm2 = vcmask (!%p942_p12), 257024  }
  0xb4   : > { %v291_v30 = vld [vmem:[#allocation2 + $0x48] sm:$0xff]  ;;  %v296_v42 = vld [vmem:[#allocation2 + $0x70] sm:$0xff]  ;;  %v286_v43 = vld [vmem:[#allocation2 + $0x20] sm:$0xff] }
  0xb5   : > { %v294_v44 = vld [vmem:[#allocation2 + $0x60] sm:$0xff]  ;;  %v289_v47 = vld [vmem:[#allocation2 + $0x38] sm:$0xff]  ;;  %v287_v53 = vld [vmem:[#allocation2 + $0x28] sm:$0xff] }
  0xb6   : > { %1021 = vmatpush3.bf16.msra.mxu0 %v1214_v3  ;;  %1058 = vmatpush3.bf16.msra.mxu1 %v1214_v3  ;;  %v297_v48 = vld [vmem:[#allocation2 + $0x78] sm:$0xff]  ;;  %v295_v54 = vld [vmem:[#allocation2 + $0x68] sm:$0xff]  ;;  %v1906_v2 = vld [vmem:[#allocation8] ss:$0 sm:$0xff] (!%p942_p12) }
  0xb7   : > { %1022 = vmatprep.subr.bf16.mxu0 %v1215_v4  ;;  %1051 = vmatprep.subr.bf16.mxu1 %v1215_v4 }
  0xba   : > { %1023 = vmatpush3.bf16.msra.mxu0 %v1215_v4  ;;  %1059 = vmatpush3.bf16.msra.mxu1 %v1215_v4 }
  0xbb   : > { %1024 = vmatprep.subr.bf16.mxu0 %v1216_v7  ;;  %1052 = vmatprep.subr.bf16.mxu1 %v1216_v7 }
  0xbe   : > { %1025 = vmatpush3.bf16.msra.mxu0 %v1216_v7  ;;  %1060 = vmatpush3.bf16.msra.mxu1 %v1216_v7 }
  0xbf   : > { %1026 = vmatprep.subr.bf16.mxu0 %v1217_v8  ;;  %1053 = vmatprep.subr.bf16.mxu1 %v1217_v8 }
  0xc2   : > { %1027 = vmatpush3.bf16.msra.mxu0 %v1217_v8  ;;  %1061 = vmatpush3.bf16.msra.mxu1 %v1217_v8 }
  0xc3   : > { %1028 = vmatprep.subr.bf16.mxu0 %v1218_v9  ;;  %1054 = vmatprep.subr.bf16.mxu1 %v1218_v9 }
  0xc6   : > { %1029 = vmatpush3.bf16.msra.mxu0 %v1218_v9  ;;  %1062 = vmatpush3.bf16.msra.mxu1 %v1218_v9 }
  0xc7   : > { %1030 = vmatprep.subr.bf16.mxu0 %v1219_v10  ;;  %1055 = vmatprep.subr.bf16.mxu1 %v1219_v10 }
  0xca   : > { %1031 = vmatpush3.bf16.msra.mxu0 %v1219_v10  ;;  %1063 = vmatpush3.bf16.msra.mxu1 %v1219_v10 }
  0xcd   : > { %1033 = vmatmul.mubr.bf16.vlgmr.msra.gmra.mrb[0].mxu0 %v1222_v11  ;;  %1041 = vmatmul.mubr.bf16.vlgmr.msra.gmra.mrb[0].mxu1 %v1223_v12 }
  0xce   : > { %1036 = vmatprep.mubr.bf16.mxu0 %v1224_v13  ;;  %1044 = vmatprep.mubr.bf16.mxu1 %v1225_v14 }
  0xd5   : > { %1037 = vmatmul.mubr.bf16.gmra.mrb[4].mxu0 %v1226_v15  ;;  %1045 = vmatmul.mubr.bf16.gmra.mrb[4].mxu1 %v1227_v16 }
 0x1a0   : > { %v1034_v21 = vpop.f32.mrb[0].mxu0  ;;  %v1042_v22 = vpop.f32.mrb[0].mxu1 }
 0x1a1   : > { %v525_v25 = vadd.f32 %v1034_v21, %v284_v17  ;;  %v533_v26 = vadd.f32 %v1042_v22, %v292_v18  ;;  %v460_v27 = vpop.f32.mrb[1].mxu0  ;;  %v492_v28 = vpop.f32.mrb[1].mxu1 }
 0x1a2   : > { %v523_v31 = vadd.f32 %v460_v27, %v282_v19  ;;  %v531_v32 = vadd.f32 %v492_v28, %v290_v20  ;;  %v1035_v33 = vpop.f32.mrb[2].mxu0  ;;  %v1043_v34 = vpop.f32.mrb[2].mxu1 }
 0x1a3   : > { %542 = vst.msk [vmem:[#allocation2 + $0x10] sm:$0xff] %vm539_vm1, %v525_v25  ;;  %550 = vst.msk [vmem:[#allocation2 + $0x50] sm:$0xff] %vm539_vm1, %v533_v26  ;;  %v526_v35 = vadd.f32 %v1035_v33, %v285_v23  ;;  %v534_v36 = vadd.f32 %v1043_v34, %v293_v24  ;;  %v463_v37 = vpop.f32.mrb[3].mxu0  ;;  %v495_v38 = vpop.f32.mrb[3].mxu1 }
 0x1a4   : > { %540 = vst.msk [vmem:[#allocation2] sm:$0xff] %vm539_vm1, %v523_v31  ;;  %548 = vst.msk [vmem:[#allocation2 + $0x40] sm:$0xff] %vm539_vm1, %v531_v32  ;;  %v524_v39 = vadd.f32 %v463_v37, %v283_v29  ;;  %v532_v40 = vadd.f32 %v495_v38, %v291_v30 }
 0x1a5   : > { %543 = vst.msk [vmem:[#allocation2 + $0x18] sm:$0xff] %vm539_vm1, %v526_v35  ;;  %551 = vst.msk [vmem:[#allocation2 + $0x58] sm:$0xff] %vm539_vm1, %v534_v36 }
 0x1a6   : > { %541 = vst.msk [vmem:[#allocation2 + $0x8] sm:$0xff] %vm539_vm1, %v524_v39  ;;  %549 = vst.msk [vmem:[#allocation2 + $0x48] sm:$0xff] %vm539_vm1, %v532_v40 }
 0x1a8   : > { %v1038_v45 = vpop.f32.mrb[4].mxu0  ;;  %v1046_v46 = vpop.f32.mrb[4].mxu1  ;;  %559 = sbr.rel (%p942_p12) target bundleno = 492 (0x1ec), region = 52 }
 0x1a9   : > { %v529_v49 = vadd.f32 %v1038_v45, %v288_v41  ;;  %v537_v50 = vadd.f32 %v1046_v46, %v296_v42  ;;  %v476_v51 = vpop.f32.mrb[5].mxu0  ;;  %v508_v52 = vpop.f32.mrb[5].mxu1 }
 0x1aa   : > { %v527_v55 = vadd.f32 %v476_v51, %v286_v43  ;;  %v535_v56 = vadd.f32 %v508_v52, %v294_v44  ;;  %v1039_v57 = vpop.f32.mrb[6].mxu0  ;;  %v1047_v58 = vpop.f32.mrb[6].mxu1  ;;  %v562_v6 = vld [vmem:[#allocation2 + $0x10] sm:$0xff] (!%p942_p12) }
 0x1ab   : > { %546 = vst.msk [vmem:[#allocation2 + $0x30] sm:$0xff] %vm539_vm1, %v529_v49  ;;  %554 = vst.msk [vmem:[#allocation2 + $0x70] sm:$0xff] %vm539_vm1, %v537_v50  ;;  %v530_v59 = vadd.f32 %v1039_v57, %v289_v47  ;;  %v538_v60 = vadd.f32 %v1047_v58, %v297_v48  ;;  %v479_v61 = vpop.f32.mrb[7].mxu0  ;;  %v511_v62 = vpop.f32.mrb[7].mxu1  ;;  %v560_v1 = vld [vmem:[#allocation2] sm:$0xff] (!%p942_p12)  ;;  %v585_v9 = vadd.f32 (!%p942_p12), %v1906_v2, %v562_v6  ;;  %v570_v26 = vld [vmem:[#allocation2 + $0x50] sm:$0xff] (!%p942_p12) }
 0x1ac   : > { %544 = vst.msk [vmem:[#allocation2 + $0x20] sm:$0xff] %vm539_vm1, %v527_v55  ;;  %552 = vst.msk [vmem:[#allocation2 + $0x60] sm:$0xff] %vm539_vm1, %v535_v56  ;;  %v528_v63 = vadd.f32 %v479_v61, %v287_v53  ;;  %v536_v0 = vadd.f32 %v511_v62, %v295_v54  ;;  %v583_v4 = vadd.f32 (!%p942_p12), %v1906_v2, %v560_v1  ;;  %v563_v7 = vld [vmem:[#allocation2 + $0x18] sm:$0xff] (!%p942_p12)  ;;  %v568_v19 = vld [vmem:[#allocation2 + $0x40] sm:$0xff] (!%p942_p12) }
 0x1ad   : > { %547 = vst.msk [vmem:[#allocation2 + $0x38] sm:$0xff] %vm539_vm1, %v530_v59  ;;  %555 = vst.msk [vmem:[#allocation2 + $0x78] sm:$0xff] %vm539_vm1, %v538_v60  ;;  %v561_v3 = vld [vmem:[#allocation2 + $0x8] sm:$0xff] (!%p942_p12)  ;;  %v586_v10 = vadd.f32 (!%p942_p12), %v1906_v2, %v563_v7  ;;  %v946_v21 = vmul.f32 (!%p942_p12), -1.442695, %v585_v9  ;;  %v591_v25 = vadd.f32 (!%p942_p12), %v1906_v2, %v568_v19  ;;  %v571_v27 = vld [vmem:[#allocation2 + $0x58] sm:$0xff] (!%p942_p12)  ;;  %v593_v32 = vadd.f32 (!%p942_p12), %v1906_v2, %v570_v26 }
 0x1ae   : > { %545 = vst.msk [vmem:[#allocation2 + $0x28] sm:$0xff] %vm539_vm1, %v528_v63  ;;  %553 = vst.msk [vmem:[#allocation2 + $0x68] sm:$0xff] %vm539_vm1, %v536_v0  ;;  %v584_v5 = vadd.f32 (!%p942_p12), %v1906_v2, %v561_v3  ;;  %v944_v15 = vmul.f32 (!%p942_p12), -1.442695, %v583_v4  ;;  %v569_v20 = vld [vmem:[#allocation2 + $0x48] sm:$0xff] (!%p942_p12)  ;;  %v594_v34 = vadd.f32 (!%p942_p12), %v1906_v2, %v571_v27 }
 0x1af   : > { %v947_v22 = vmul.f32 -1.442695, %v586_v10  ;;  %v592_v29 = vadd.f32 %v1906_v2, %v569_v20  ;;  %v952_v35 = vmul.f32 -1.442695, %v591_v25  ;;  %v954_v38 = vmul.f32 -1.442695, %v593_v32 }
 0x1b0   : > { %v945_v16 = vmul.f32 -1.442695, %v584_v5  ;;  %1228 = vpow2.f32 %v944_v15  ;;  %v955_v39 = vmul.f32 -1.442695, %v594_v34 }
 0x1b1   : > { %v953_v37 = vmul.f32 -1.442695, %v592_v29 }
 0x1b2   : > { %v566_v13 = vld [vmem:[#allocation2 + $0x30] sm:$0xff]  ;;  %1230 = vpow2.f32 %v945_v16 }
 0x1b3   : > { %v564_v8 = vld [vmem:[#allocation2 + $0x20] sm:$0xff]  ;;  %v589_v18 = vadd.f32 %v1906_v2, %v566_v13  ;;  %1232 = vpow2.f32 %v946_v21  ;;  %v574_v55 = vld [vmem:[#allocation2 + $0x70] sm:$0xff] }
 0x1b4   : > { %v587_v11 = vadd.f32 %v1906_v2, %v564_v8  ;;  %v567_v14 = vld [vmem:[#allocation2 + $0x38] sm:$0xff]  ;;  %v572_v30 = vld [vmem:[#allocation2 + $0x60] sm:$0xff]  ;;  %1234 = vpow2.f32 %v947_v22  ;;  %v597_v0 = vadd.f32 %v1906_v2, %v574_v55 }
 0x1b5   : > { %v565_v12 = vld [vmem:[#allocation2 + $0x28] sm:$0xff]  ;;  %v590_v23 = vadd.f32 %v1906_v2, %v567_v14  ;;  %v950_v31 = vmul.f32 -1.442695, %v589_v18  ;;  %v595_v36 = vadd.f32 %v1906_v2, %v572_v30  ;;  %v575_v58 = vld [vmem:[#allocation2 + $0x78] sm:$0xff] }
 0x1b6   : > { %v588_v17 = vadd.f32 %v1906_v2, %v565_v12  ;;  %v948_v24 = vmul.f32 -1.442695, %v587_v11  ;;  %v573_v52 = vld [vmem:[#allocation2 + $0x68] sm:$0xff]  ;;  %v598_v4 = vadd.f32 %v1906_v2, %v575_v58  ;;  %v958_v12 = vmul.f32 -1.442695, %v597_v0 }
 0x1b7   : > { %v951_v33 = vmul.f32 -1.442695, %v590_v23  ;;  %v956_v40 = vmul.f32 -1.442695, %v595_v36  ;;  %v596_v61 = vadd.f32 %v1906_v2, %v573_v52 }
 0x1b8   : > { %v949_v28 = vmul.f32 -1.442695, %v588_v17  ;;  %1236 = vpow2.f32 %v948_v24  ;;  %v959_v15 = vmul.f32 -1.442695, %v598_v4 }
 0x1b9   : > { %v957_v9 = vmul.f32 -1.442695, %v596_v61 }
 0x1ba   : > { %1238 = vpow2.f32 %v949_v28  ;;  %v1229_v41 = vpop.eup %1228 }
 0x1bb   : > { %1240 = vpow2.f32 %v950_v31  ;;  %v647_v43 = vadd.f32 1.0, %v1229_v41 }
 0x1bc   : > { %1242 = vpow2.f32 %v951_v33  ;;  %v1231_v42 = vpop.eup %1230 }
 0x1bd   : > { %1244 = vpow2.f32 %v952_v35  ;;  %v1233_v44 = vpop.eup %1232  ;;  %v648_v45 = vadd.f32 1.0, %v1231_v42 }
 0x1be   : > { %1246 = vpow2.f32 %v953_v37  ;;  %v1235_v46 = vpop.eup %1234  ;;  %v649_v47 = vadd.f32 1.0, %v1233_v44 }
 0x1bf   : > { %1248 = vpow2.f32 %v954_v38  ;;  %v650_v49 = vadd.f32 1.0, %v1235_v46 }
 0x1c0   : > { %1250 = vpow2.f32 %v955_v39 }
 0x1c1   : > { %1252 = vpow2.f32 %v956_v40 }
 0x1c2   : > { %1254 = vrcp.f32 %v647_v43  ;;  %v1237_v48 = vpop.eup %1236 }
 0x1c3   : > { %1256 = vrcp.f32 %v648_v45  ;;  %v651_v51 = vadd.f32 1.0, %v1237_v48 }
 0x1c4   : > { %v1239_v50 = vpop.eup %1238  ;;  %1258 = vrcp.f32 %v649_v47 }
 0x1c5   : > { %v1241_v53 = vpop.eup %1240  ;;  %1260 = vrcp.f32 %v650_v49  ;;  %v652_v54 = vadd.f32 1.0, %v1239_v50 }
 0x1c6   : > { %v1243_v56 = vpop.eup %1242  ;;  %1262 = vrcp.f32 %v651_v51  ;;  %v653_v57 = vadd.f32 1.0, %v1241_v53 }
 0x1c7   : > { %v1245_v59 = vpop.eup %1244  ;;  %1264 = vrcp.f32 %v652_v54  ;;  %v654_v60 = vadd.f32 1.0, %v1243_v56 }
 0x1c8   : > { %v1247_v62 = vpop.eup %1246  ;;  %1266 = vrcp.f32 %v653_v57  ;;  %v655_v63 = vadd.f32 1.0, %v1245_v59 }
 0x1c9   : > { %v1249_v1 = vpop.eup %1248  ;;  %1268 = vrcp.f32 %v654_v60  ;;  %v656_v3 = vadd.f32 1.0, %v1247_v62 }
 0x1ca   : > { %v1251_v5 = vpop.eup %1250  ;;  %1270 = vrcp.f32 %v655_v63  ;;  %v657_v6 = vadd.f32 1.0, %v1249_v1 }
 0x1cb   : > { %v1253_v7 = vpop.eup %1252  ;;  %1272 = vrcp.f32 %v656_v3  ;;  %v658_v8 = vadd.f32 1.0, %v1251_v5 }
 0x1cc   : > { %v1255_v10 = vpop.eup %1254  ;;  %1274 = vrcp.f32 %v657_v6  ;;  %v659_v11 = vadd.f32 1.0, %v1253_v7 }
 0x1cd   : > { %v1257_v13 = vpop.eup %1256  ;;  %v983_v14 = vpack.c.bf16 %v1255_v10, %v1255_v10  ;;  %1276 = vrcp.f32 %v658_v8 }
 0x1ce   : > { %v1259_v2 = vpop.eup %1258  ;;  %v984_v16 = vpack.c.bf16 %v1257_v13, %v1257_v13  ;;  %1278 = vrcp.f32 %v659_v11 }
 0x1cf   : > { %v1261_v17 = vpop.eup %1260  ;;  %760 = vst.msk [vmem:[%s1854_s15] sm:$0xf] %vm759_vm2, %v983_v14  ;;  %v985_v18 = vpack.c.bf16 %v1259_v2, %v1259_v2  ;;  %1280 = vpow2.f32 %v957_v9 }
 0x1d0   : > { %v1263_v19 = vpop.eup %1262  ;;  %761 = vst.msk [vmem:[%s1854_s15 + $0x4] sm:$0xf] %vm759_vm2, %v984_v16  ;;  %v986_v20 = vpack.c.bf16 %v1261_v17, %v1261_v17  ;;  %1282 = vpow2.f32 %v958_v12 }
 0x1d1   : > { %v1265_v21 = vpop.eup %1264  ;;  %762 = vst.msk [vmem:[%s1854_s15 + $0x8] sm:$0xf] %vm759_vm2, %v985_v18  ;;  %v987_v22 = vpack.c.bf16 %v1263_v19, %v1263_v19  ;;  %1284 = vpow2.f32 %v959_v15 }
 0x1d2   : > { %v1267_v23 = vpop.eup %1266  ;;  %763 = vst.msk [vmem:[%s1854_s15 + $0xc] sm:$0xf] %vm759_vm2, %v986_v20  ;;  %v988_v24 = vpack.c.bf16 %v1265_v21, %v1265_v21 }
 0x1d3   : > { %v1269_v25 = vpop.eup %1268  ;;  %764 = vst.msk [vmem:[%s1854_s15 + $0x10] sm:$0xf] %vm759_vm2, %v987_v22  ;;  %v989_v26 = vpack.c.bf16 %v1267_v23, %v1267_v23 }
 0x1d4   : > { %v1271_v27 = vpop.eup %1270  ;;  %765 = vst.msk [vmem:[%s1854_s15 + $0x14] sm:$0xf] %vm759_vm2, %v988_v24  ;;  %v990_v28 = vpack.c.bf16 %v1269_v25, %v1269_v25 }
 0x1d5   : > { %v1273_v29 = vpop.eup %1272  ;;  %766 = vst.msk [vmem:[%s1854_s15 + $0x18] sm:$0xf] %vm759_vm2, %v989_v26  ;;  %v991_v30 = vpack.c.bf16 %v1271_v27, %v1271_v27 }
 0x1d6   : > { %v1275_v31 = vpop.eup %1274  ;;  %767 = vst.msk [vmem:[%s1854_s15 + $0x1c] sm:$0xf] %vm759_vm2, %v990_v28  ;;  %v992_v32 = vpack.c.bf16 %v1273_v29, %v1273_v29 }
 0x1d7   : > { %v1277_v33 = vpop.eup %1276  ;;  %768 = vst.msk [vmem:[%s1854_s15 + $0x20] sm:$0xf] %vm759_vm2, %v991_v30  ;;  %v993_v34 = vpack.c.bf16 %v1275_v31, %v1275_v31 }
 0x1d8   : > { %v1279_v35 = vpop.eup %1278  ;;  %769 = vst.msk [vmem:[%s1854_s15 + $0x24] sm:$0xf] %vm759_vm2, %v992_v32  ;;  %v994_v36 = vpack.c.bf16 %v1277_v33, %v1277_v33 }
 0x1d9   : > { %v1281_v37 = vpop.eup %1280  ;;  %770 = vst.msk [vmem:[%s1854_s15 + $0x28] sm:$0xf] %vm759_vm2, %v993_v34  ;;  %v995_v38 = vpack.c.bf16 %v1279_v35, %v1279_v35 }
 0x1da   : > { %v1283_v39 = vpop.eup %1282  ;;  %771 = vst.msk [vmem:[%s1854_s15 + $0x2c] sm:$0xf] %vm759_vm2, %v994_v36  ;;  %v660_v40 = vadd.f32 1.0, %v1281_v37 }
 0x1db   : > { %v1285_v41 = vpop.eup %1284  ;;  %772 = vst.msk [vmem:[%s1854_s15 + $0x30] sm:$0xf] %vm759_vm2, %v995_v38  ;;  %v661_v42 = vadd.f32 1.0, %v1283_v39 }
 0x1dc   : > { %1286 = vrcp.f32 %v660_v40  ;;  %v662_v43 = vadd.f32 1.0, %v1285_v41 }
 0x1dd   : > { %1288 = vrcp.f32 %v661_v42 }
 0x1de   : > { %1290 = vrcp.f32 %v662_v43 }
 0x1e6   : > { %v1287_v44 = vpop.eup %1286 }
 0x1e7   : > { %v1289_v45 = vpop.eup %1288  ;;  %v996_v46 = vpack.c.bf16 %v1287_v44, %v1287_v44 }
 0x1e8   : > { %v1291_v47 = vpop.eup %1290  ;;  %v997_v48 = vpack.c.bf16 %v1289_v45, %v1289_v45 }
 0x1e9   : > { %773 = vst.msk [vmem:[%s1854_s15 + $0x34] sm:$0xf] %vm759_vm2, %v996_v46  ;;  %v998_v49 = vpack.c.bf16 %v1291_v47, %v1291_v47 }
 0x1ea   : > { %774 = vst.msk [vmem:[%s1854_s15 + $0x38] sm:$0xf] %vm759_vm2, %v997_v48 }
 0x1eb   : > { %775 = vst.msk [vmem:[%s1854_s15 + $0x3c] sm:$0xf] %vm759_vm2, %v998_v49 }
 0x1ec PF: > { %s2106_s3 = sld [smem:[#allocation17_spill]]  ;;  %s2108_s11 = sld [smem:[#allocation20_spill]] }
 0x1ed   : > { %s2109_s12 = sld [smem:[#allocation26_spill]]  ;;  %s790_s21 = sshll.u32 %s1854_s15, 4  ;;  %s1963_s21 = int_to_ptr.vmem [resolvable:$true] %s790_s21 }
 0x1ee   : > { %s1967_s0 = scalar_lea.sflag [#allocation5], %s254_s8  ;;  %s1380_s24 = scalar_lea.vmem %s1963_s21, 1024 }
 0x1ef   : > { %p1381_p0 = scmp.ne.s32.totalorder %s1963_s21, %s1380_s24  ;;  %s1543_s10 = smov [#allocation9]  }
 0x1f0   : > { %s1384_s22 = sshll.u32 %s1543_s10, 4  ;;  %s1385_s22 = int_to_ptr.vmem [resolvable:$false] %s1384_s22 }
 0x1f1   : > { %s1386_s4 = scalar_lea.vmem %s1385_s22, 2048  ;;  %p1387_p8 = scmp.lt.s32.totalorder %s1963_s21, %s1385_s22 }
 0x1f2   : > { %s999_s6 = sshll.u32 %s2106_s3, 10  ;;  %p2111_p4 = scmp.ne.s32.totalorder %s2108_s11, 0 }
 0x1f3   : > { %s2110_s5 = smov %s2109_s12  ;;  %s1960_s28 = scalar_lea.hbm %s2109_s12, %s999_s6 }
 0x1f4   : > { %p1382_p10 = pnand %p1381_p0, %p2111_p4  ;;  %p1388_p6 = scmp.lt.s32.totalorder %s1386_s4, %s1380_s24 }
 0x1f6   : > { %p1383_p13 = pneg %p1382_p10  ;;  %p1389_p2 = por %p1388_p6, %p1387_p8 }
 0x1f8   : > { %p1390_p1 = pnand %p1389_p2, %p1383_p13 }
 0x1fa   : > { %1393 = shalt.err (!%p1390_p1)
}
 0x1fb   : > { %s1394_s8 = scalar_lea.hbm %s1960_s28, 1024  ;;  %s1398_s30 = scalar_lea.hbm %s2110_s5, 2048 }
 0x1fc   : > { %p1395_p9 = scmp.ne.s32.totalorder %s1960_s28, %s1394_s8  ;;  %p1399_p7 = scmp.lt.u32.totalorder %s1960_s28, %s2110_s5 }
 0x1fd   : > { %p1400_p11 = scmp.lt.u32.totalorder %s1398_s30, %s1394_s8  ;;  %p1402_p0 = scmp.lt.u32.totalorder %s1394_s8, %s1960_s28 }
 0x1fe   : > { %p1396_p3 = pnand %p1395_p9, %p2111_p4 }
 0x1ff   : > { %p1401_p12 = por %p1400_p11, %p1399_p7 }
 0x200   : > { %p1397_p5 = pneg %p1396_p3 }
 0x201   : > { %p1403_p10 = por %p1402_p0, %p1401_p12 }
 0x203   : > { %p1404_p13 = pnand %p1403_p10, %p1397_p5 }
 0x205   : > { %1407 = shalt.err (!%p1404_p13)
}
 0x206   : > { %s1544_s29 = smov 64   ;;  %s1545_s6 = smov 4  }
 0x207   : > { %1072 = dma.vmem_to_hbm [thread:$0]  (%p2111_p4), %s1963_s21, 1024, %s1960_s28, %s1967_s0, %s1544_s29, %s1544_s29, %s1545_s6  }
 0x208 PF: > { %s2112_s13 = sld [smem:[#allocation14_spill]]  ;;  %s2113_s7 = sld [smem:[#allocation21_spill]] }
 0x209   : > { %p1092_p8 = scmp.ge.s32.totalorder %s1534_s25, 2 }
 0x20e   : > { %s805_s12 = sand.u32 1, %s2112_s13   ;;  %p2114_p6 = scmp.ne.s32.totalorder %s2113_s7, 0 }
 0x20f   : > { %s806_s24 = scalar_lea.sflag [#allocation5], %s805_s12 }
 0x210   : > { %p1086_p2 = pnand %p1092_p8, %p2114_p6 }
 0x212   : > { %1477 = dma.done.wait (!%p1086_p2), %s806_s24, 1024  }
 0x213   : > { %1479 = vsyncadd (!%p1086_p2), %s806_s24, 4294966272  ;;  %s22_s25 = sadd.s32 1, %s1534_s25   ;;  %s2116_s12 = sld [smem:[#allocation15_spill]] }
 0x214   : > { %p1996_p1 = scmp.ge.s32.totalorder %s22_s25, 6   ;;  %s2117_s22 = sld [smem:[#allocation18_spill]] }
 0x215   : > { %s2118_s11 = sld [smem:[#allocation22_spill]]  ;;  %s2119_s24 = sld [smem:[#allocation23_spill]] }
 0x216   : > { %s2120_s13 = smov %s1490_s14  ;;  %s2121_s14 = smov %s1750_s18 }
 0x217   : > { %s2122_s15 = smov %s1498_s16  ;;  %s2123_s16 = smov %s1502_s17 }
 0x218   : > { %s2124_s17 = smov %s1738_s2  ;;  %s2125_s18 = smov %s1510_s19 }
 0x219   : > { %s2126_s19 = smov %s1514_s20  ;;  %s2127_s20 = smov %s1755_s9 }
 0x21a   : > { %s2128_s21 = smov %s1526_s23  ;;  %21 = sbr.rel (!%p1996_p1) target bundleno = 16 (0x10), region = 102 }
 0x21b   : > { %s2129_s23 = smov %s2118_s11 }
 0x221   :  { %811 = vsyncpa [#allocation4], 1 }
 0x222   :  { %813 = vsyncpa [#allocation4 + $0x1], 1 }
 0x223   :  { %814 = vsyncpa [#allocation7], 1 }
 0x224   :  { %816 = vsyncpa [#allocation7 + $0x1], 1 }
 0x225   :  { %817 = vsyncpa [#allocation5], 1 }
 0x226   :  { %819 = vsyncpa [#allocation5 + $0x1], 1 }

</bundles_post_ra>
